<compile_context>
chip_gen: v7x
topology: tpu7x:2x2x1
jax: 0.10.0
libtpu: 0.0.40
codegen_flags: <defaults>
</compile_context>

<pallas_src>
import jax
import jax.numpy as jnp
from jax.experimental import pallas as pl
from jax.experimental.pallas import tpu as pltpu


def _round_up(n, m):
    return ((n + m - 1) // m) * m


def _pick_node_tile(V):
    """Node tile TV (lane dim of H^T / sublane dim of x). Returns (V_pad, TV)."""
    V_pad = _round_up(V, 128)
    TV = min(512, V_pad)            # ~512 is the measured HBM-roofline sweet spot
    V_pad = _round_up(V_pad, TV)    # keep the node grid exact (zero rows are masked)
    return V_pad, TV


def _pick_batch_tile(B, E_pad, max_rows=1024):
    """Batch tile TB: keep all batches resident when the stacked row count is
    modest (x/H^T streamed once); else a sublane-aligned divisor of B."""
    if B * E_pad <= max_rows:
        return B
    best = None
    for tb in range(8, B, 8):
        if B % tb == 0 and tb * E_pad <= max_rows:
            best = tb
    if best is not None:
        return best
    # TODO(synk): pad B when it has no sublane-aligned divisor that fits VMEM.
    return B


def _make_kernel(TB, E_pad, d_pad, col_g, inv_E):
    TBE = TB * E_pad

    def kernel(ids_ref,      # VMEM (1, TV)       i32 : node -> batch id (-1 = pad)
               x_ref,        # VMEM (TV, d_pad)   bf16: [x*1/cnt | 1/cnt col | zeros]
               HT_ref,       # VMEM (E_pad, TV)   bf16: H^T (zero-padded edge rows)
               Wt_ref,       # VMEM (d_pad,d_pad) f32 : W^T zero-padded
               bias_ref,     # VMEM (1, d_pad)    f32
               c_ref,        # out  (TB, d_pad)
               he_ref,       # out  (TBE, d_pad)
               acc_ref,      # scratch (TBE, d_pad) f32 : edge-mean (+ g column) accum
               mhs_ref):     # scratch (TBE, TV)    bf16: stacked masked H^T
        t = pl.program_id(0)
        vi = pl.program_id(1)
        nv = pl.num_programs(1)
        b_base = t * TB

        @pl.when(vi == 0)
        def _():
            acc_ref[...] = jnp.zeros_like(acc_ref)

        ids = ids_ref[...]                      # (1, TV)
        HT = HT_ref[...]                        # (E_pad, TV) bf16
        zeros = jnp.zeros_like(HT)
        # Per-batch masked H^T blocks stacked along M into VMEM.  Pure select:
        # 1/cnt is already folded into x_aug on the host.  Padded nodes have
        # id == -1 and never match.
        for b in range(TB):
            mhs_ref[pl.ds(b * E_pad, E_pad), :] = jnp.where(
                ids == (b_base + b), HT, zeros)

        # scatter(reduce='mean') over nodes, accumulated across node tiles.
        # Column `col_g` of x_aug carries 1/cnt, so acc[:, col_g] accumulates the
        # per-edge pooled weight g for free on the MXU (ones-column trick).
        acc_ref[...] += jnp.dot(mhs_ref[...], x_ref[...],
                                preferred_element_type=jnp.float32)

        @pl.when(vi == nv - 1)
        def _():
            acc = acc_ref[...]                                   # (TBE, d_pad)
            g = acc[:, col_g:col_g + 1] * inv_E                  # (TBE, 1), 1/E folded

            # self.f = Linear(in_ch, in_ch) + ReLU.  Rows of W^T beyond d are
            # zero, so the g column / zero padding never leak into the result.
            edge_act = jnp.maximum(
                jnp.dot(acc, Wt_ref[...], preferred_element_type=jnp.float32)
                + bias_ref[...], 0.0)                            # (TBE, d_pad)
            he_ref[...] = edge_act.astype(he_ref.dtype)

            # c[b,:] = (1/E) * sum_e g[(b,e)] * edge_act[(b,e),:]
            weighted = edge_act * g                              # (TBE, d_pad)
            rows = [jnp.sum(weighted[b * E_pad:(b + 1) * E_pad, :],
                            axis=0, keepdims=True)
                    for b in range(TB)]
            c_ref[...] = jnp.concatenate(rows, axis=0).astype(c_ref.dtype)

    return kernel


def hgnn_forward(x, H, batch, W, bias, num_batches):
    V, d = x.shape
    E = H.shape[1]
    B = int(num_batches)

    # --- padded geometry ---
    d_pad = _round_up(d + 1, 128)       # +1: ones column for the pooled weight g
    col_g = d
    E_pad = _round_up(E, 16)            # bf16 sublane alignment for the H^T stack
    V_pad, TV = _pick_node_tile(V)
    TB = _pick_batch_tile(B, E_pad)
    TBE = TB * E_pad
    nbt = B // TB
    nvt = V_pad // TV

    # --- one-time host-side prep (outside the hot loop) ---
    batch_i32 = batch.astype(jnp.int32)
    counts = jnp.zeros((B,), jnp.int32).at[batch_i32].add(1)        # exact, no (B,V) mat
    inv_cnt = 1.0 / jnp.maximum(counts, 1).astype(jnp.float32)      # empty-batch guard
    inv_node = inv_cnt[batch_i32]                                   # (V,)

    ids = jnp.full((1, V_pad), -1, jnp.int32).at[0, :V].set(batch_i32)

    x_aug = jnp.zeros((V_pad, d_pad), jnp.bfloat16)
    x_aug = x_aug.at[:V, :d].set(
        (x.astype(jnp.float32) * inv_node[:, None]).astype(jnp.bfloat16))
    x_aug = x_aug.at[:V, col_g].set(inv_node.astype(jnp.bfloat16))

    HT = jnp.zeros((E_pad, V_pad), jnp.bfloat16).at[:E, :V].set(
        jnp.transpose(H).astype(jnp.bfloat16))
    Wt = jnp.zeros((d_pad, d_pad), jnp.float32).at[:d, :d].set(
        jnp.transpose(W).astype(jnp.float32))
    bias2 = jnp.zeros((1, d_pad), jnp.float32).at[0, :d].set(bias.astype(jnp.float32))

    kernel = _make_kernel(TB, E_pad, d_pad, col_g, 1.0 / E)

    # TODO(synk): add pipeline_mode=pl.Buffered(3) on the x/H^T specs and an
    # explicit 2-TensorCore split of the node reduction for v7x when nbt == 1.
    c_pad, he_pad = pl.pallas_call(
        kernel,
        out_shape=(jax.ShapeDtypeStruct((B, d_pad), x.dtype),
                   jax.ShapeDtypeStruct((B * E_pad, d_pad), x.dtype)),
        grid_spec=pltpu.PrefetchScalarGridSpec(
            num_scalar_prefetch=0,
            grid=(nbt, nvt),
            in_specs=[
                pl.BlockSpec((1, TV), lambda t, v: (0, v)),          # batch ids
                pl.BlockSpec((TV, d_pad), lambda t, v: (v, 0)),      # x_aug (bf16)
                pl.BlockSpec((E_pad, TV), lambda t, v: (0, v)),      # H^T (bf16)
                pl.BlockSpec((d_pad, d_pad), lambda t, v: (0, 0)),   # W^T (f32)
                pl.BlockSpec((1, d_pad), lambda t, v: (0, 0)),       # bias
            ],
            out_specs=[
                pl.BlockSpec((TB, d_pad), lambda t, v: (t, 0)),      # c
                pl.BlockSpec((TBE, d_pad), lambda t, v: (t, 0)),     # h_e
            ],
            scratch_shapes=[
                pltpu.VMEM((TBE, d_pad), jnp.float32),               # edge accumulator
                pltpu.VMEM((TBE, TV), jnp.bfloat16),                 # stacked masked H^T
            ],
        ),
        compiler_params=pltpu.CompilerParams(
            dimension_semantics=("parallel", "arbitrary"),
            vmem_limit_bytes=32 * 1024 * 1024),
    )(ids, x_aug, HT, Wt, bias2)

    c = c_pad[:, :d]
    h_e = he_pad.reshape(B, E_pad, d_pad)[:, :E, :d].reshape(B * E, d)
    return c, h_e


def ref_forward(x, H, batch, W, bias, B):
    """Pure-JAX f32 reference mirroring the PyTorch forward exactly."""
    V, d = x.shape
    E = H.shape[1]
    expand = x[:, None, :] * H[:, :, None]                        # (V, E, d)
    counts = jnp.zeros((B,), x.dtype).at[batch].add(1.0)
    edge_sum = jnp.zeros((B, E, d), x.dtype).at[batch].add(expand)
    edge_dim = edge_sum / counts[:, None, None]                   # scatter mean
    flat = edge_dim.reshape(-1, d)
    flat = jnp.maximum(flat @ W.T + bias, 0.0)                    # self.f
    edge_dim = flat.reshape(B, E, d)
    rep = edge_dim[batch]                                         # repeat_interleave
    node_emb = (rep * H[:, :, None]).mean(axis=1)                 # (V, d)
    c = (jnp.zeros((B, d), x.dtype).at[batch].add(node_emb)
         / counts[:, None])                                       # global_mean_pool
    h_e = edge_dim.reshape(-1, d)
    return c, h_e


if __name__ == "__main__":
    B, V, E, d = 2, 16, 8, 32
    key = jax.random.PRNGKey(0)
    kx, kh, kw, kb = jax.random.split(key, 4)

    x = jax.random.normal(kx, (V, d), dtype=jnp.float32)
    batch = jnp.repeat(jnp.arange(B), V // B)                     # node -> batch id

    # "batch-wise diagonal" incidence: nodes only touch their own batch's edges
    edge_batch = jnp.repeat(jnp.arange(B), E // B)
    block_mask = (batch[:, None] == edge_batch[None, :]).astype(jnp.float32)
    H = (jax.random.uniform(kh, (V, E)) > 0.5).astype(jnp.float32) * block_mask

    # deterministic Linear(in_ch, in_ch) params
    W = jax.random.normal(kw, (d, d), dtype=jnp.float32) * 0.1
    bias = jax.random.normal(kb, (d,), dtype=jnp.float32) * 0.1

    c, h_e = hgnn_forward(x, H, batch, W, bias, B)
    jax.block_until_ready((c, h_e))

    c_ref, he_ref = ref_forward(x, H, batch, W, bias, B)
    # bf16 MXU feed for x / H^T -> looser tolerance than the all-f32 path.
    assert jnp.allclose(c, c_ref, atol=5e-2, rtol=5e-2), "c mismatch"
    assert jnp.allclose(h_e, he_ref, atol=5e-2, rtol=5e-2), "h_e mismatch"
    print("KERNEL_OK")
</pallas_src>

<mosaic_0001>
module attributes {stable_mosaic.version = 11 : i64} {
  func.func @kernel(%arg0: i32, %arg1: i32, %arg2: memref<1x128xi32, #tpu.memory_space<vmem>>, %arg3: memref<128x128xbf16, #tpu.memory_space<vmem>>, %arg4: memref<16x128xbf16, #tpu.memory_space<vmem>>, %arg5: memref<128x128xf32, #tpu.memory_space<vmem>>, %arg6: memref<1x128xf32, #tpu.memory_space<vmem>>, %arg7: memref<2x128xf32, #tpu.memory_space<vmem>>, %arg8: memref<32x128xf32, #tpu.memory_space<vmem>>, %arg9: memref<32x128xf32, #tpu.memory_space<vmem>>, %arg10: memref<32x128xbf16, #tpu.memory_space<vmem>>) attributes {dimension_semantics = [#tpu.dimension_semantics<parallel>, #tpu.dimension_semantics<arbitrary>], iteration_bounds = array<i64: 1, 1>, scalar_prefetch = 0 : i64, scratch_operands = 2 : i64, tpu.core_type = #tpu.core_type<tc>, window_params = [{transform_indices = @transform_0, window_bounds = array<i64: 1, 128>}, {transform_indices = @transform_1, window_bounds = array<i64: 128, 128>}, {transform_indices = @transform_2, window_bounds = array<i64: 16, 128>}, {pipeline_mode = #tpu.pipeline_mode<synchronous>, transform_indices = @transform_3, window_bounds = array<i64: 128, 128>}, {pipeline_mode = #tpu.pipeline_mode<synchronous>, transform_indices = @transform_4, window_bounds = array<i64: 1, 128>}, {transform_indices = @transform_5, window_bounds = array<i64: 2, 128>}, {transform_indices = @transform_6, window_bounds = array<i64: 32, 128>}]} {
    %c2_i32 = arith.constant 2 : i32
    %0 = arith.muli %arg0, %c2_i32 : i32
    %c0_i32 = arith.constant 0 : i32
    %1 = arith.cmpi eq, %arg1, %c0_i32 : i32
    %2 = arith.extui %1 : i1 to i32
    %c0_i32_0 = arith.constant 0 : i32
    %3 = arith.cmpi ne, %2, %c0_i32_0 : i32
    scf.if %3 {
      %cst_19 = arith.constant 0.000000e+00 : f32
      %30 = vector.broadcast %cst_19 : f32 to vector<32x128xf32>
      %c0_20 = arith.constant 0 : index
      %c0_21 = arith.constant 0 : index
      %31 = vector.load %arg9[%c0_20, %c0_21] : memref<32x128xf32, #tpu.memory_space<vmem>>, vector<32x128xf32>
      tpu.vector_store %arg9[%c0_20, %c0_21], %30 {strides = array<i32>} : memref<32x128xf32, #tpu.memory_space<vmem>>, vector<32x128xf32>,
    } else {
    }
    %c0 = arith.constant 0 : index
    %c0_1 = arith.constant 0 : index
    %4 = vector.load %arg2[%c0, %c0_1] : memref<1x128xi32, #tpu.memory_space<vmem>>, vector<1x128xi32>
    %c0_2 = arith.constant 0 : index
    %c0_3 = arith.constant 0 : index
    %5 = vector.load %arg4[%c0_2, %c0_3] : memref<16x128xbf16, #tpu.memory_space<vmem>>, vector<16x128xbf16>
    %cst = arith.constant 0.000000e+00 : bf16
    %6 = vector.broadcast %cst : bf16 to vector<16x128xbf16>
    %c0_i32_4 = arith.constant 0 : i32
    %7 = arith.addi %0, %c0_i32_4 : i32
    %8 = vector.broadcast %7 : i32 to vector<1x128xi32>
    %9 = arith.cmpi eq, %4, %8 : vector<1x128xi32>
    %10 = vector.shape_cast %9 : vector<1x128xi1> to vector<1x128xi1>
    %11 = vector.broadcast %10 : vector<1x128xi1> to vector<16x128xi1>
    %12 = arith.select %11, %5, %6 : vector<16x128xi1>, vector<16x128xbf16>
    %c0_5 = arith.constant 0 : index
    %c0_6 = arith.constant 0 : index
    %13 = vector.load %arg10[%c0_5, %c0_6] : memref<32x128xbf16, #tpu.memory_space<vmem>>, vector<16x128xbf16>
    tpu.vector_store %arg10[%c0_5, %c0_6], %12 {strides = array<i32>} : memref<32x128xbf16, #tpu.memory_space<vmem>>, vector<16x128xbf16>,
    %c1_i32 = arith.constant 1 : i32
    %14 = arith.addi %0, %c1_i32 : i32
    %15 = vector.broadcast %14 : i32 to vector<1x128xi32>
    %16 = arith.cmpi eq, %4, %15 : vector<1x128xi32>
    %17 = vector.shape_cast %16 : vector<1x128xi1> to vector<1x128xi1>
    %18 = vector.broadcast %17 : vector<1x128xi1> to vector<16x128xi1>
    %19 = arith.select %18, %5, %6 : vector<16x128xi1>, vector<16x128xbf16>
    %c16 = arith.constant 16 : index
    %c0_7 = arith.constant 0 : index
    %20 = vector.load %arg10[%c16, %c0_7] : memref<32x128xbf16, #tpu.memory_space<vmem>>, vector<16x128xbf16>
    tpu.vector_store %arg10[%c16, %c0_7], %19 {strides = array<i32>} : memref<32x128xbf16, #tpu.memory_space<vmem>>, vector<16x128xbf16>,
    %c0_8 = arith.constant 0 : index
    %c0_9 = arith.constant 0 : index
    %21 = vector.load %arg9[%c0_8, %c0_9] : memref<32x128xf32, #tpu.memory_space<vmem>>, vector<32x128xf32>
    %c0_10 = arith.constant 0 : index
    %c0_11 = arith.constant 0 : index
    %22 = vector.load %arg10[%c0_10, %c0_11] : memref<32x128xbf16, #tpu.memory_space<vmem>>, vector<32x128xbf16>
    %c0_12 = arith.constant 0 : index
    %c0_13 = arith.constant 0 : index
    %23 = vector.load %arg3[%c0_12, %c0_13] : memref<128x128xbf16, #tpu.memory_space<vmem>>, vector<128x128xbf16>
    %cst_14 = arith.constant dense<0.000000e+00> : vector<32x128xf32>
    %24 = tpu.matmul %22, %23, %cst_14 {dimension_numbers = #tpu.dot_dimension_numbers<[1], [0], [0], [1], [0, 0, 1, 1], [], []>} : vector<32x128xbf16>, vector<128x128xbf16>, vector<32x128xf32> -> vector<32x128xf32>
    %25 = arith.addf %21, %24 : vector<32x128xf32>
    %c0_15 = arith.constant 0 : index
    %c0_16 = arith.constant 0 : index
    %26 = vector.load %arg9[%c0_15, %c0_16] : memref<32x128xf32, #tpu.memory_space<vmem>>, vector<32x128xf32>
    tpu.vector_store %arg9[%c0_15, %c0_16], %25 {strides = array<i32>} : memref<32x128xf32, #tpu.memory_space<vmem>>, vector<32x128xf32>,
    %c0_i32_17 = arith.constant 0 : i32
    %27 = arith.cmpi eq, %arg1, %c0_i32_17 : i32
    %28 = arith.extui %27 : i1 to i32
    %c0_i32_18 = arith.constant 0 : i32
    %29 = arith.cmpi ne, %28, %c0_i32_18 : i32
    scf.if %29 {
      %c0_19 = arith.constant 0 : index
      %c0_20 = arith.constant 0 : index
      %30 = vector.load %arg9[%c0_19, %c0_20] : memref<32x128xf32, #tpu.memory_space<vmem>>, vector<32x128xf32>
      %31 = vector.extract_strided_slice %30 {offsets = [0, 32], sizes = [32, 1], strides = [1, 1]} : vector<32x128xf32> to vector<32x1xf32>
      %cst_21 = arith.constant 1.250000e-01 : f32
      %32 = vector.broadcast %cst_21 : f32 to vector<32x1xf32>
      %33 = arith.mulf %31, %32 : vector<32x1xf32>
      %c0_22 = arith.constant 0 : index
      %c0_23 = arith.constant 0 : index
      %34 = vector.load %arg5[%c0_22, %c0_23] : memref<128x128xf32, #tpu.memory_space<vmem>>, vector<128x128xf32>
      %cst_24 = arith.constant dense<0.000000e+00> : vector<32x128xf32>
      %35 = tpu.matmul %30, %34, %cst_24 {dimension_numbers = #tpu.dot_dimension_numbers<[1], [0], [0], [1], [0, 0, 1, 1], [], []>} : vector<32x128xf32>, vector<128x128xf32>, vector<32x128xf32> -> vector<32x128xf32>
      %c0_25 = arith.constant 0 : index
      %c0_26 = arith.constant 0 : index
      %36 = vector.load %arg6[%c0_25, %c0_26] : memref<1x128xf32, #tpu.memory_space<vmem>>, vector<1x128xf32>
      %37 = vector.broadcast %36 : vector<1x128xf32> to vector<32x128xf32>
      %38 = arith.addf %35, %37 : vector<32x128xf32>
      %cst_27 = arith.constant 0.000000e+00 : f32
      %39 = vector.broadcast %cst_27 : f32 to vector<32x128xf32>
      %40 = arith.maximumf %38, %39 : vector<32x128xf32>
      %c0_28 = arith.constant 0 : index
      %c0_29 = arith.constant 0 : index
      %41 = vector.load %arg8[%c0_28, %c0_29] : memref<32x128xf32, #tpu.memory_space<vmem>>, vector<32x128xf32>
      tpu.vector_store %arg8[%c0_28, %c0_29], %40 {strides = array<i32>} : memref<32x128xf32, #tpu.memory_space<vmem>>, vector<32x128xf32>,
      %42 = vector.broadcast %33 : vector<32x1xf32> to vector<32x128xf32>
      %43 = arith.mulf %40, %42 : vector<32x128xf32>
      %44 = vector.extract_strided_slice %43 {offsets = [0, 0], sizes = [16, 128], strides = [1, 1]} : vector<32x128xf32> to vector<16x128xf32>
      %cst_30 = arith.constant dense<0.000000e+00> : vector<128xf32>
      %45 = vector.multi_reduction <add>, %44, %cst_30 [0] : vector<16x128xf32> to vector<128xf32>
      %46 = vector.shape_cast %45 : vector<128xf32> to vector<1x128xf32>
      %47 = vector.extract_strided_slice %43 {offsets = [16, 0], sizes = [16, 128], strides = [1, 1]} : vector<32x128xf32> to vector<16x128xf32>
      %cst_31 = arith.constant dense<0.000000e+00> : vector<128xf32>
      %48 = vector.multi_reduction <add>, %47, %cst_31 [0] : vector<16x128xf32> to vector<128xf32>
      %49 = vector.shape_cast %48 : vector<128xf32> to vector<1x128xf32>
      %50 = tpu.concatenate %46, %49 in 0 : vector<1x128xf32>, vector<1x128xf32> -> vector<2x128xf32>
      %c0_32 = arith.constant 0 : index
      %c0_33 = arith.constant 0 : index
      %51 = vector.load %arg7[%c0_32, %c0_33] : memref<2x128xf32, #tpu.memory_space<vmem>>, vector<2x128xf32>
      tpu.vector_store %arg7[%c0_32, %c0_33], %50 {strides = array<i32>} : memref<2x128xf32, #tpu.memory_space<vmem>>, vector<2x128xf32>,
    } else {
    }
    return
  }
  func.func @transform_0(%arg0: i32, %arg1: i32) -> (i32, i32) {
    %c0_i32 = arith.constant 0 : i32
    %c0_i32_0 = arith.constant 0 : i32
    return %c0_i32, %arg1 : i32, i32
  }
  func.func @transform_1(%arg0: i32, %arg1: i32) -> (i32, i32) {
    %c0_i32 = arith.constant 0 : i32
    %c0_i32_0 = arith.constant 0 : i32
    return %arg1, %c0_i32 : i32, i32
  }
  func.func @transform_2(%arg0: i32, %arg1: i32) -> (i32, i32) {
    %c0_i32 = arith.constant 0 : i32
    %c0_i32_0 = arith.constant 0 : i32
    return %c0_i32, %arg1 : i32, i32
  }
  func.func @transform_3(%arg0: i32, %arg1: i32) -> (i32, i32) {
    %c0_i32 = arith.constant 0 : i32
    %c0_i32_0 = arith.constant 0 : i32
    %c0_i32_1 = arith.constant 0 : i32
    return %c0_i32, %c0_i32_0 : i32, i32
  }
  func.func @transform_4(%arg0: i32, %arg1: i32) -> (i32, i32) {
    %c0_i32 = arith.constant 0 : i32
    %c0_i32_0 = arith.constant 0 : i32
    %c0_i32_1 = arith.constant 0 : i32
    return %c0_i32, %c0_i32_0 : i32, i32
  }
  func.func @transform_5(%arg0: i32, %arg1: i32) -> (i32, i32) {
    %c0_i32 = arith.constant 0 : i32
    %c0_i32_0 = arith.constant 0 : i32
    return %arg0, %c0_i32 : i32, i32
  }
  func.func @transform_6(%arg0: i32, %arg1: i32) -> (i32, i32) {
    %c0_i32 = arith.constant 0 : i32
    %c0_i32_0 = arith.constant 0 : i32
    return %arg0, %c0_i32 : i32, i32
  }
}

</mosaic_0001>

<bundles_post_ra>
// kernel: tpu_custom_call.1
= control target key start
LH: loop header
LB: loop body
LE: loop exit
PB: predicated region body
PF: predicated region fallthrough
CT: control target
= control target key end

     0   :  { %12 = vsyncpa [#allocation5], 0  ;;  %s884_s0 = inlined_call_operand.hbm [shape: s32[1,128], index: 0, kind: input, shape index: {}]   ;;  %s885_s1 = inlined_call_operand.hbm [shape: bf16[128,128], index: 1, kind: input, shape index: {}]   ;;  %s886_s2 = inlined_call_operand.hbm [shape: bf16[16,128], index: 2, kind: input, shape index: {}]   ;;  %s887_s3 = inlined_call_operand.hbm [shape: f32[128,128], index: 3, kind: input, shape index: {}]   ;;  %s888_s4 = inlined_call_operand.vmem [shape: f32[1,128], index: 4, kind: input, shape index: {}]   ;;  %s889_s5 = inlined_call_operand.hbm [shape: f32[2,128], index: 5, kind: output, shape index: {0}]   ;;  %s890_s6 = inlined_call_operand.hbm [shape: f32[32,128], index: 6, kind: output, shape index: {1}]  }
   0x1   :  { %13 = vsyncpa [#allocation8], 0 }
   0x2   :  { %14 = vsyncpa [#allocation11], 0 }
   0x3   :  { %15 = vsyncpa [#allocation6], 0 }
   0x4   :  { %16 = vsyncpa [#allocation14], 0  ;;  %s750_s21 = smov [#allocation7]   ;;  %s608_s25 = scalar_lea.hbm %s885_s1, 1024 }
   0x5   :  { %s32_s22 = sshll.u32 %s750_s21, 4  ;;  %p609_p0 = scmp.ne.s32.totalorder %s885_s1, %s608_s25  ;;  %s33_s22 = int_to_ptr.vmem [resolvable:$true] %s32_s22 }
   0x6   :  { %p612_p1 = scmp.lt.u32.totalorder %s608_s25, %s885_s1 }
   0x8   :  { %p614_p2 = pnand %p612_p1, %p609_p0 }
   0xa   :  { %617 = shalt.err (!%p614_p2)
}
   0xb   :  { %s618_s30 = scalar_lea.vmem %s33_s22, 1024  ;;  %p623_p4 = scmp.lt.s32.totalorder %s33_s22, %s33_s22 }
   0xc   :  { %p619_p3 = scmp.ne.s32.totalorder %s33_s22, %s618_s30  ;;  %p624_p5 = scmp.lt.s32.totalorder %s618_s30, %s618_s30 }
   0xe   :  { %p625_p6 = por %p624_p5, %p623_p4 }
  0x10   :  { %p626_p7 = pnand %p625_p6, %p619_p3 }
  0x12   :  { %629 = shalt.err (!%p626_p7)
}
  0x13   :  { %s751_s7 = smov 64   ;;  %s752_s8 = smov 4  }
  0x14   :  { %38 = dma.hbm_to_vmem [thread:$0]  %s885_s1, 1024, %s33_s22, [#allocation8], %s751_s7, %s751_s7, %s752_s8  }
  0x15   :  { %s753_s11 = smov [#allocation4]   ;;  %s754_s13 = smov [#allocation9]  }
  0x16   :  { %s23_s12 = sshll.u32 %s753_s11, 4  ;;  %s44_s14 = sshll.u32 %s754_s13, 4  ;;  %s24_s12 = int_to_ptr.vmem [resolvable:$true] %s23_s12  ;;  %s45_s14 = int_to_ptr.vmem [resolvable:$true] %s44_s14 }
  0x17   :  { %s630_s17 = scalar_lea.hbm %s884_s0, 16 }
  0x18   :  { %p631_p8 = scmp.ne.s32.totalorder %s884_s0, %s630_s17  ;;  %p634_p9 = scmp.lt.u32.totalorder %s630_s17, %s884_s0 }
  0x1a   :  { %p636_p10 = pnand %p634_p9, %p631_p8 }
  0x1c   :  { %639 = shalt.err (!%p636_p10)
}
  0x1d   :  { %s640_s1 = scalar_lea.vmem %s24_s12, 16  ;;  %s644_s22 = scalar_lea.vmem %s24_s12, 32 }
  0x1e   :  { %p641_p11 = scmp.ne.s32.totalorder %s24_s12, %s640_s1  ;;  %p645_p12 = scmp.lt.s32.totalorder %s24_s12, %s24_s12 }
  0x1f   :  { %p646_p13 = scmp.lt.s32.totalorder %s644_s22, %s640_s1 }
  0x21   :  { %p647_p0 = por %p646_p13, %p645_p12 }
  0x23   :  { %p648_p1 = pnand %p647_p0, %p641_p11 }
  0x25   :  { %651 = shalt.err (!%p648_p1)
}
  0x26   :  { %26 = dma.hbm_to_vmem [thread:$0]  %s884_s0, 16, %s24_s12, [#allocation5]  }
  0x27   :  { %s652_s27 = scalar_lea.hbm %s886_s2, 128 }
  0x28   :  { %p653_p2 = scmp.ne.s32.totalorder %s886_s2, %s652_s27  ;;  %p656_p3 = scmp.lt.u32.totalorder %s652_s27, %s886_s2 }
  0x2a   :  { %p658_p4 = pnand %p656_p3, %p653_p2 }
  0x2c   :  { %661 = shalt.err (!%p658_p4)
}
  0x2d   :  { %s662_s10 = scalar_lea.vmem %s45_s14, 128  ;;  %p667_p6 = scmp.lt.s32.totalorder %s45_s14, %s45_s14 }
  0x2e   :  { %p663_p5 = scmp.ne.s32.totalorder %s45_s14, %s662_s10  ;;  %p668_p7 = scmp.lt.s32.totalorder %s662_s10, %s662_s10 }
  0x30   :  { %p669_p8 = por %p668_p7, %p667_p6 }
  0x32   :  { %p670_p9 = pnand %p669_p8, %p663_p5 }
  0x34   :  { %673 = shalt.err (!%p670_p9)
}
  0x35   :  { %50 = dma.hbm_to_vmem [thread:$0]  %s886_s2, 128, %s45_s14, [#allocation8], %s751_s7, %s751_s7, %s752_s8  }
  0x36   :  { %s755_s12 = smov [#allocation10]   ;;  %s674_s17 = scalar_lea.hbm %s887_s3, 2048 }
  0x37   :  { %s56_s13 = sshll.u32 %s755_s12, 4  ;;  %p675_p10 = scmp.ne.s32.totalorder %s887_s3, %s674_s17  ;;  %s57_s13 = int_to_ptr.vmem [resolvable:$true] %s56_s13 }
  0x38   :  { %p678_p11 = scmp.lt.u32.totalorder %s674_s17, %s887_s3 }
  0x3a   :  { %p680_p12 = pnand %p678_p11, %p675_p10 }
  0x3c   :  { %683 = shalt.err (!%p680_p12)
}
  0x3d   :  { %s684_s1 = scalar_lea.vmem %s57_s13, 2048  ;;  %p689_p0 = scmp.lt.s32.totalorder %s57_s13, %s57_s13 }
  0x3e   :  { %p685_p13 = scmp.ne.s32.totalorder %s57_s13, %s684_s1  ;;  %p690_p1 = scmp.lt.s32.totalorder %s684_s1, %s684_s1 }
  0x40   :  { %p691_p2 = por %p690_p1, %p689_p0 }
  0x42   :  { %p692_p3 = pnand %p691_p2, %p685_p13 }
  0x44   :  { %695 = shalt.err (!%p692_p3)
}
  0x45   :  { %s756_s2 = smov 128   ;;  %s757_s7 = smov 8  }
  0x46   :  { %62 = dma.hbm_to_vmem [thread:$0]  %s887_s3, 2048, %s57_s13, [#allocation11], %s756_s2, %s756_s2, %s757_s7  }
  0x47   :  { %740 = dma.done.wait [#allocation5], 16  }
  0x48   :  { %741 = vsyncadd [#allocation5], 4294967280 }
  0x49   :  { %742 = dma.done.wait [#allocation8], 1152  }
  0x4a   :  { %743 = vsyncadd [#allocation8], 4294966144 }
  0x4b   :  { %744 = dma.done.wait [#allocation11], 2048  }
  0x4c   :  { %745 = vsyncadd [#allocation11], 4294965248  ;;  %v93_v0 = vlaneseq  ;;  %v600_v1 = vld [vmem:[#allocation7] sm:$0xff]   ;;  %v601_v2 = vld [vmem:[#allocation7 + $0x8] sm:$0xff]   ;;  %v758_v11 = vmov 0   ;;  %v759_v49 = vmov 32  }
  0x4d   :  { %496 = vmatprep.subr.bf16.mxu0 %v600_v1  ;;  %v602_v4 = vld [vmem:[#allocation7 + $0x10] sm:$0xff]   ;;  %v603_v6 = vld [vmem:[#allocation7 + $0x18] sm:$0xff]   ;;  %v265_v8 = vld [vmem:[#allocation10] sm:$0xff]  ;;  %599 = vset.pattern.permute.xlu1 %v759_v49  ;;  %s760_s23 = smov [#allocation13]  }
  0x4e   :  { %497 = vmatpush3.bf16.msra.mxu0 %v600_v1  ;;  %v94_v3 = vshrl.u32 %v93_v0, 7  ;;  %v87_v7 = vld [vmem:[#allocation4] sm:$0x1]  ;;  %v266_v9 = vld [vmem:[#allocation10 + $0x8] sm:$0xff]  ;;  %v268_v14 = vld [vmem:[#allocation10 + $0x18] sm:$0xff]  ;;  %598 = vset.pattern.permute.xlu0 %v759_v49  ;;  %s437_s24 = sshll.u32 %s760_s23, 4  ;;  %s438_s24 = int_to_ptr.vmem [resolvable:$true] %s437_s24 }
  0x4f   :  { %498 = vmatprep.subr.bf16.mxu0 %v601_v2  ;;  %vm91_vm0 = vcmp.eq.s32.totalorder %v87_v7, 0  ;;  %v267_v10 = vld [vmem:[#allocation10 + $0x10] sm:$0xff]  ;;  %v554_v13 = vpack.c.bf16 %v266_v9, %v265_v8  ;;  %vm110_vm1 = vcmp.eq.s32.totalorder %v87_v7, 1  ;;  %v269_v17 = vld [vmem:[#allocation10 + $0x20] sm:$0xff]  ;;  %v270_v18 = vld [vmem:[#allocation10 + $0x28] sm:$0xff]  ;;  %p701_p5 = scmp.lt.s32.totalorder %s438_s24, %s438_s24 }
  0x50   :  { %v95_v5 = vsub.s32 0, %v94_v3  ;;  %v92_v12 = vsel %vm91_vm0, 1, %v758_v11  ;;  %v558_v16 = vpack.c.bf16 %v268_v14, %v267_v10  ;;  %v604_v19 = vld [vmem:[#allocation7 + $0x20] sm:$0xff]   ;;  %v111_v22 = vsel %vm110_vm1, 1, %v758_v11  ;;  %v271_v26 = vld [vmem:[#allocation10 + $0x30] sm:$0xff]  ;;  %v605_v28 = vld [vmem:[#allocation7 + $0x28] sm:$0xff]  }
  0x51   :  { %v88_v20 = vld [vmem:[#allocation9] sm:$0xf]  ;;  %v89_v21 = vld [vmem:[#allocation9 + $0x4] sm:$0xf]  ;;  %555 = vmatprep.subr.bf16.mxu1 %v554_v13  ;;  %v562_v23 = vpack.c.bf16 %v270_v18, %v269_v17  ;;  %v273_v32 = vld [vmem:[#allocation10 + $0x40] sm:$0xff] }
  0x52   :  { %499 = vmatpush3.bf16.msra.mxu0 %v601_v2  ;;  %v96_v15 = vrot.slane %v92_v12, %v95_v5  ;;  %557 = vmatpush3.bf16.msra.mxu1 %v554_v13  ;;  %v272_v27 = vld [vmem:[#allocation10 + $0x38] sm:$0xff]  ;;  %v115_v30 = vrot.slane %v111_v22, %v95_v5  ;;  %v274_v33 = vld [vmem:[#allocation10 + $0x48] sm:$0xff]  ;;  %v275_v36 = vld [vmem:[#allocation10 + $0x50] sm:$0xff] }
  0x53   :  { %500 = vmatprep.subr.bf16.mxu0 %v602_v4  ;;  %559 = vmatprep.subr.bf16.mxu1 %v558_v16  ;;  %v566_v31 = vpack.c.bf16 %v272_v27, %v271_v26  ;;  %v606_v34 = vld [vmem:[#allocation7 + $0x30] sm:$0xff]   ;;  %v570_v35 = vpack.c.bf16 %v274_v33, %v273_v32  ;;  %v276_v37 = vld [vmem:[#allocation10 + $0x58] sm:$0xff]  ;;  %v607_v38 = vld [vmem:[#allocation7 + $0x38] sm:$0xff]  }
  0x54   :  { %vm97_vm2 = vcmp.eq.s32.totalorder %v96_v15, 1  ;;  %vm116_vm4 = vcmp.eq.s32.totalorder %v115_v30, 1  ;;  %v574_v39 = vpack.c.bf16 %v276_v37, %v275_v36  ;;  %v277_v42 = vld [vmem:[#allocation10 + $0x60] sm:$0xff]  ;;  %v278_v43 = vld [vmem:[#allocation10 + $0x68] sm:$0xff]  ;;  %v279_v46 = vld [vmem:[#allocation10 + $0x70] sm:$0xff] }
  0x55   :  { %vm98_vm3 = vmpackc.low %vm97_vm2, %vm97_vm2  ;;  %v578_v45 = vpack.c.bf16 %v278_v43, %v277_v42  ;;  %v280_v47 = vld [vmem:[#allocation10 + $0x78] sm:$0xff]  ;;  %v465_v59 = vld [vmem:[%s888_s4] ss:$0 sm:$0xff]  ;;  %s696_s4 = scalar_lea.vmem %s438_s24, 512 }
  0x56   :  { %501 = vmatpush3.bf16.msra.mxu0 %v602_v4  ;;  %v99_v24 = vsel %vm98_vm3, %v88_v20, 0  ;;  %v100_v25 = vsel %vm98_vm3, %v89_v21, 0  ;;  %561 = vmatpush3.bf16.msra.mxu1 %v558_v16  ;;  %vm117_vm5 = vmpackc.low %vm116_vm4, %vm116_vm4  ;;  %v582_v48 = vpack.c.bf16 %v280_v47, %v279_v46  ;;  %p697_p4 = scmp.ne.s32.totalorder %s438_s24, %s696_s4  ;;  %p702_p6 = scmp.lt.s32.totalorder %s696_s4, %s696_s4 }
  0x57   :  { %502 = vmatprep.subr.bf16.mxu0 %v603_v6  ;;  %v455_v29 = vcombine.low %v99_v24, %v100_v25  ;;  %563 = vmatprep.subr.bf16.mxu1 %v562_v23  ;;  %v118_v40 = vsel %vm117_vm5, %v88_v20, 0  ;;  %v119_v41 = vsel %vm117_vm5, %v89_v21, 0 }
  0x58   :  { %v456_v44 = vcombine.low %v118_v40, %v119_v41  ;;  %p703_p7 = por %p702_p6, %p701_p5 }
  0x59   :  { %512 = vmatprep.mubr.bf16.mxu0 %v455_v29 }
  0x5a   :  { %503 = vmatpush3.bf16.msra.mxu0 %v603_v6  ;;  %565 = vmatpush3.bf16.msra.mxu1 %v562_v23  ;;  %p704_p8 = pnand %p703_p7, %p697_p4 }
  0x5b   :  { %504 = vmatprep.subr.bf16.mxu0 %v604_v19  ;;  %567 = vmatprep.subr.bf16.mxu1 %v566_v31 }
  0x5e   :  { %505 = vmatpush3.bf16.msra.mxu0 %v604_v19  ;;  %569 = vmatpush3.bf16.msra.mxu1 %v566_v31 }
  0x5f   :  { %506 = vmatprep.subr.bf16.mxu0 %v605_v28  ;;  %571 = vmatprep.subr.bf16.mxu1 %v570_v35 }
  0x62   :  { %507 = vmatpush3.bf16.msra.mxu0 %v605_v28  ;;  %573 = vmatpush3.bf16.msra.mxu1 %v570_v35 }
  0x63   :  { %508 = vmatprep.subr.bf16.mxu0 %v606_v34  ;;  %575 = vmatprep.subr.bf16.mxu1 %v574_v39 }
  0x66   :  { %509 = vmatpush3.bf16.msra.mxu0 %v606_v34  ;;  %577 = vmatpush3.bf16.msra.mxu1 %v574_v39 }
  0x67   :  { %510 = vmatprep.subr.bf16.mxu0 %v607_v38  ;;  %579 = vmatprep.subr.bf16.mxu1 %v578_v45 }
  0x6a   :  { %511 = vmatpush3.bf16.msra.mxu0 %v607_v38  ;;  %581 = vmatpush3.bf16.msra.mxu1 %v578_v45 }
  0x6b   :  { %583 = vmatprep.subr.bf16.mxu1 %v582_v48 }
  0x6d   :  { %513 = vmatmul.mubr.bf16.vlgmr.msra.gmra.mrb[0].mxu0 %v456_v44 }
  0x6e   :  { %585 = vmatpush3.bf16.msra.mxu1 %v582_v48 }
 0x140   :  { %v514_v50 = vpop.f32.mrb[0].mxu0 }
 0x141   :  { %v231_v51 = vpop.f32.mrb[1].mxu0  ;;  %v263_v52 = vmul.f32 0.125, %v514_v50 }
 0x142   :  { %v515_v53 = vpop.f32.mrb[2].mxu0  ;;  %548 = vmatprep.mubr.f32.mxu1 %v231_v51  ;;  %v261_v54 = vmul.f32 0.125, %v231_v51 }
 0x143   :  { %393 = vperm.xlu1 %599, %v263_v52   ;;  %v234_v55 = vpop.f32.mrb[3].mxu0  ;;  %v264_v56 = vmul.f32 0.125, %v515_v53 }
 0x144   :  { %383 = vperm.xlu0 %598, %v261_v54   ;;  %549 = vmatmul.mubr.f32.vlgmr.msra.gmra.mrb[0].mxu1 %v234_v55  ;;  %v262_v57 = vmul.f32 0.125, %v234_v55 }
 0x145   :  { %551 = vmatprep.mubr.f32.mxu1 %v514_v50 }
 0x147   :  { %398 = vperm.xlu1 %599, %v264_v56  }
 0x148   :  { %552 = vmatmul.mubr.f32.gmra.mrb[2].mxu1 %v515_v53  ;;  %388 = vperm.xlu0 %598, %v262_v57  }
 0x1c2   :  { %v394_v63 = vpop.permute.xlu1 %393 }
 0x1c3   :  { %v384_v58 = vpop.permute.xlu0 %383 }
 0x1c6   :  { %v399_v11 = vpop.permute.xlu1 %398 }
 0x1c7   :  { %v389_v2 = vpop.permute.xlu0 %388 }
 0x217   :  { %v550_v60 = vpop.f32.mrb[0].mxu1 }
 0x218   :  { %v360_v61 = vadd.f32 %v550_v60, %v465_v59  ;;  %v354_v62 = vpop.f32.mrb[1].mxu1 }
 0x219   :  { %v355_v0 = vadd.f32 %v465_v59, %v354_v62 }
 0x21a   :  { %v374_v1 = vmax.f32 %v360_v61, 0.0 }
 0x21b   :  { %v373_v3 = vmax.f32 %v355_v0, 0.0  ;;  %v553_v4 = vpop.f32.mrb[2].mxu1 }
 0x21c   :  { %378 = vst [vmem:[#allocation13 + $0x8] sm:$0xff] %v374_v1  ;;  %v402_v5 = vmul.f32 %v389_v2, %v374_v1  ;;  %v370_v6 = vadd.f32 %v553_v4, %v465_v59  ;;  %v364_v7 = vpop.f32.mrb[3].mxu1 }
 0x21d   :  { %377 = vst [vmem:[#allocation13] sm:$0xff] %v373_v3  ;;  %v401_v8 = vmul.f32 %v384_v58, %v373_v3  ;;  %v365_v9 = vadd.f32 %v465_v59, %v364_v7 }
 0x21e   :  { %v376_v10 = vmax.f32 %v370_v6, 0.0 }
 0x21f   :  { %v405_v12 = vadd.f32 %v402_v5, %v401_v8  ;;  %v375_v13 = vmax.f32 %v365_v9, 0.0 }
 0x220   :  { %380 = vst [vmem:[#allocation13 + $0x18] sm:$0xff] %v376_v10  ;;  %v404_v14 = vmul.f32 %v399_v11, %v376_v10 }
 0x221   :  { %v406_v15 = vrot.slane %v405_v12, 4  ;;  %379 = vst [vmem:[#allocation13 + $0x10] sm:$0xff] %v375_v13  ;;  %v403_v16 = vmul.f32 %v394_v63, %v375_v13 }
 0x222   :  { %707 = shalt.err (!%p704_p8)
}
 0x223   :  { %s708_s27 = scalar_lea.hbm %s890_s6, 512 }
 0x224   :  { %p709_p9 = scmp.ne.s32.totalorder %s890_s6, %s708_s27  ;;  %p712_p10 = scmp.lt.u32.totalorder %s708_s27, %s890_s6 }
 0x226   :  { %p714_p11 = pnand %p712_p10, %p709_p9 }
 0x228   :  { %717 = shalt.err (!%p714_p11)
}
 0x229   :  { %443 = dma.vmem_to_hbm [thread:$0]  %s438_s24, 512, %s890_s6, [#allocation14], %s756_s2, %s756_s2, %s757_s7   ;;  %v407_v17 = vadd.f32 %v406_v15, %v405_v12  ;;  %v412_v18 = vadd.f32 %v404_v14, %v403_v16  ;;  %vm419_vm6 = vcmask 1040384  }
 0x22a   :  { %s761_s11 = smov [#allocation12]  }
 0x22b   :  { %v408_v19 = vrot.slane %v407_v17, 2  ;;  %v413_v20 = vrot.slane %v412_v18, 4  ;;  %s428_s12 = sshll.u32 %s761_s11, 4  ;;  %s429_s12 = int_to_ptr.vmem [resolvable:$true] %s428_s12 }
 0x22c   :  { %s718_s13 = scalar_lea.vmem %s429_s12, 32  ;;  %p723_p13 = scmp.lt.s32.totalorder %s429_s12, %s429_s12 }
 0x22d   :  { %v409_v21 = vadd.f32 %v408_v19, %v407_v17  ;;  %v414_v22 = vadd.f32 %v413_v20, %v412_v18  ;;  %p719_p12 = scmp.ne.s32.totalorder %s429_s12, %s718_s13  ;;  %p724_p0 = scmp.lt.s32.totalorder %s718_s13, %s718_s13 }
 0x22f   :  { %v415_v23 = vrot.slane %v414_v22, 2  ;;  %v410_v25 = vrot.slane %v409_v21, 1  ;;  %p725_p1 = por %p724_p0, %p723_p13 }
 0x231   :  { %v416_v24 = vadd.f32 %v415_v23, %v414_v22  ;;  %v411_v27 = vadd.f32 %v410_v25, %v409_v21  ;;  %p726_p2 = pnand %p725_p1, %p719_p12 }
 0x233   :  { %v417_v26 = vrot.slane %v416_v24, 1 }
 0x235   :  { %v418_v28 = vadd.f32 %v417_v26, %v416_v24 }
 0x237   :  { %v420_v29 = vsel %vm419_vm6, %v411_v27, %v418_v28 }
 0x238   :  { %421 = vst [vmem:[#allocation12] sm:$0x3] %v420_v29 }
 0x239   :  { %729 = shalt.err (!%p726_p2)
}
 0x23a   :  { %s730_s16 = scalar_lea.hbm %s889_s5, 32 }
 0x23b   :  { %p731_p3 = scmp.ne.s32.totalorder %s889_s5, %s730_s16  ;;  %p734_p4 = scmp.lt.u32.totalorder %s730_s16, %s889_s5 }
 0x23d   :  { %p736_p5 = pnand %p734_p4, %p731_p3 }
 0x23f   :  { %739 = shalt.err (!%p736_p5)
}
 0x240   :  { %431 = dma.vmem_to_hbm [thread:$0]  %s429_s12, 32, %s889_s5, [#allocation6]  }
 0x241   :  { %746 = dma.done.wait [#allocation6], 32  }
 0x242   :  { %747 = vsyncadd [#allocation6], 4294967264 }
 0x243   :  { %748 = dma.done.wait [#allocation14], 512  }
 0x244   :  { %749 = vsyncadd [#allocation14], 4294966784 }
 0x245   :  { %450 = vsyncpa [#allocation5], 1 }
 0x246   :  { %451 = vsyncpa [#allocation8], 1 }
 0x247   :  { %452 = vsyncpa [#allocation11], 1 }
 0x248   :  { %453 = vsyncpa [#allocation6], 1 }
 0x249   :  { %454 = vsyncpa [#allocation14], 1 }

</bundles_post_ra>
